<compile_context>
chip_gen: v5e
topology: v5e:2x2
jax: 0.10.0
libtpu: 0.0.40
codegen_flags: <defaults>
</compile_context>

<pallas_src>
import functools

import jax
import jax.numpy as jnp
import numpy as np
from jax.experimental import pallas as pl
from jax.experimental.pallas import tpu as pltpu

LANES = 128
ROW_GROUP = 8 * LANES          # ray-padding granularity (one (8,128) f32 tile)


def _accumulate(acc_ref, contrib):
    """Fold a (R, W) contribution into the (8, W) VMEM-resident accumulator."""
    r, w = contrib.shape
    acc_ref[...] += contrib.reshape(r // 8, 8, w).sum(axis=0)


def _neilf_losses_kernel(*refs, block_rows, steps_per_split, n_valid_rows,
                         need_row_mask, remove_black, use_var):
    if use_var:
        (fold_ref, expand_ref, gt_ref, rgb_ref, mask_ref, met_ref,
         rough_ref, var_ref,
         msum_ref, rgbsum_ref, regsum_ref, varsum_ref) = refs
    else:
        (fold_ref, expand_ref, gt_ref, rgb_ref, mask_ref, met_ref,
         msum_ref, rgbsum_ref, regsum_ref) = refs
        rough_ref = var_ref = varsum_ref = None

    c = pl.program_id(0)          # split index (parallel / core-parallel axis)
    i = pl.program_id(1)          # reduction step within the split

    @pl.when(i == 0)
    def _():
        msum_ref[...] = jnp.zeros_like(msum_ref)
        rgbsum_ref[...] = jnp.zeros_like(rgbsum_ref)
        regsum_ref[...] = jnp.zeros_like(regsum_ref)
        if use_var:
            varsum_ref[...] = jnp.zeros_like(varsum_ref)

    gt = gt_ref[...].astype(jnp.float32)       # (R, 384) ray/channel interleaved
    rgb = rgb_ref[...].astype(jnp.float32)     # (R, 384)
    mask = mask_ref[...].astype(jnp.float32)   # (R, 128) one lane per ray

    if remove_black:
        # per-ray count of positive gt channels via the 0/1 fold matrix (exact)
        pos = (gt > 0.0).astype(jnp.float32)
        cnt = jnp.dot(pos, fold_ref[...], preferred_element_type=jnp.float32)
        mask = mask * (cnt > 0.0).astype(jnp.float32)

    # Broadcast the 0/1 per-ray mask to the 3 channel lanes (exact 0/1 matmul).
    mask3 = jnp.dot(mask, expand_ref[...], preferred_element_type=jnp.float32)

    m_c = mask                                              # (R, 128)
    rgb_c = jnp.abs(rgb - gt) * mask3                       # (R, 384)
    reg_c = jnp.abs(met_ref[...].astype(jnp.float32)) * mask
    if use_var:
        var_min, var_max = 0.01, 0.15
        tgt_min, tgt_max = 0.25, 0.75
        t = (var_ref[...].astype(jnp.float32) - var_min) * (1.0 / (var_max - var_min))
        tgt = (1.0 - jnp.clip(t, 0.0, 1.0)) * (tgt_max - tgt_min) + tgt_min
        var_c = jnp.abs(rough_ref[...].astype(jnp.float32) - tgt) * mask
    else:
        var_c = None

    if need_row_mask:
        # Only emitted when the grid can overhang / duplicate blocks; zeroes
        # contributions from rows past the valid range (using the *unclamped*
        # grid position so clamped duplicate blocks are fully masked).
        row0 = (c * steps_per_split + i) * block_rows
        lim = n_valid_rows - row0
        valid = jax.lax.broadcasted_iota(jnp.int32, (block_rows, LANES), 0) < lim
        valid3 = jax.lax.broadcasted_iota(jnp.int32, (block_rows, 3 * LANES), 0) < lim
        m_c = jnp.where(valid, m_c, 0.0)
        rgb_c = jnp.where(valid3, rgb_c, 0.0)
        reg_c = jnp.where(valid, reg_c, 0.0)
        if use_var:
            var_c = jnp.where(valid, var_c, 0.0)

    _accumulate(msum_ref, m_c)
    _accumulate(rgbsum_ref, rgb_c)
    _accumulate(regsum_ref, reg_c)
    if use_var:
        _accumulate(varsum_ref, var_c)


def _pad_rows(x, target_rows):
    n = x.shape[0]
    if n == target_rows:
        return x
    pads = [(0, target_rows - n)] + [(0, 0)] * (x.ndim - 1)
    return jnp.pad(x, pads)


def neilf_loss(model_outputs, ground_truth, progress_iter, *,
               lambertian_weighting=0.001, smoothness_weighting=0.0005,
               trace_weighting=0.1, var_weighting=1.0,
               mono_neilf=False, remove_black=False,
               tile_rows=512, num_splits=1, core_parallel=False):
    # ---- phase 'mat' per-ray inputs ----
    rgb_gt = ground_truth['rgb'].reshape(-1, 3)
    n_rays = rgb_gt.shape[0]
    rgb = model_outputs['ray_rgb'].reshape(-1, 3)
    masks = model_outputs['render_masks'].reshape(-1)
    if not jnp.issubdtype(masks.dtype, jnp.floating):
        masks = masks.astype(jnp.int8)      # bool -> 1 B/ray stream; f32 cast in-kernel
    metallic = model_outputs['metallic'].reshape(-1)
    use_var = ('rgb_var' in model_outputs) and (progress_iter <= 1000)

    # ---- lane-dense packing: 128 rays per row, 8-row granularity ----
    pad_n = ((n_rays + ROW_GROUP - 1) // ROW_GROUP) * ROW_GROUP
    n_rows = pad_n // LANES                              # multiple of 8

    rgb_gt_d = _pad_rows(rgb_gt, pad_n).reshape(n_rows, 3 * LANES)
    rgb_d = _pad_rows(rgb, pad_n).reshape(n_rows, 3 * LANES)
    mask_d = _pad_rows(masks, pad_n).reshape(n_rows, LANES)   # pad value 0 -> no contribution
    met_d = _pad_rows(metallic, pad_n).reshape(n_rows, LANES)

    dense_inputs = [rgb_gt_d, rgb_d, mask_d, met_d]
    if use_var:
        rough_d = _pad_rows(model_outputs['roughness'].reshape(-1), pad_n
                            ).reshape(n_rows, LANES)
        var_d = _pad_rows(model_outputs['rgb_var'].reshape(-1), pad_n
                          ).reshape(n_rows, LANES)
        dense_inputs += [rough_d, var_d]

    # Constant 0/1 channel matrices (fetched once; exact on the MXU).
    lane = jnp.arange(LANES, dtype=jnp.int32)
    chan = jnp.arange(3 * LANES, dtype=jnp.int32)
    fold = (chan[:, None] // 3 == lane[None, :]).astype(jnp.float32)      # (384,128)
    expand = (lane[:, None] == chan[None, :] // 3).astype(jnp.float32)    # (128,384)

    # ---- grid geometry ----
    if n_rows <= tile_rows:
        block_rows = n_rows                               # single full-extent block
    else:
        block_rows = max(32, (int(tile_rows) // 32) * 32)  # int8/bf16-safe tiling
    total_blocks = (n_rows + block_rows - 1) // block_rows
    num_splits = max(1, min(int(num_splits), total_blocks))
    steps = (total_blocks + num_splits - 1) // num_splits
    last_block = total_blocks - 1
    need_row_mask = (n_rows % block_rows != 0) or (num_splits * steps != total_blocks)

    def in_idx(c, i):
        # Clamp so a split never asks for a block fully past the array end;
        # its rows are then masked in-kernel via the unclamped position.
        return (jnp.minimum(c * steps + i, last_block), 0)

    fold_spec = pl.BlockSpec((3 * LANES, LANES), lambda c, i: (0, 0))
    expand_spec = pl.BlockSpec((LANES, 3 * LANES), lambda c, i: (0, 0))
    spec3 = pl.BlockSpec((block_rows, 3 * LANES), in_idx)
    spec1 = pl.BlockSpec((block_rows, LANES), in_idx)
    in_specs = [fold_spec, expand_spec, spec3, spec3, spec1, spec1]
    if use_var:
        in_specs += [spec1, spec1]

    acc128_spec = pl.BlockSpec((None, 8, LANES), lambda c, i: (c, 0, 0))
    acc384_spec = pl.BlockSpec((None, 8, 3 * LANES), lambda c, i: (c, 0, 0))
    acc128_shape = jax.ShapeDtypeStruct((num_splits, 8, LANES), jnp.float32)
    acc384_shape = jax.ShapeDtypeStruct((num_splits, 8, 3 * LANES), jnp.float32)
    out_shape = [acc128_shape, acc384_shape, acc128_shape]
    out_specs = [acc128_spec, acc384_spec, acc128_spec]
    if use_var:
        out_shape.append(acc128_shape)
        out_specs.append(acc128_spec)

    kernel = functools.partial(
        _neilf_losses_kernel, block_rows=block_rows, steps_per_split=steps,
        n_valid_rows=n_rows, need_row_mask=need_row_mask,
        remove_black=remove_black, use_var=use_var)

    if num_splits > 1 and core_parallel:
        # v7x: actually shard the split axis across the 2 TensorCores.
        dim_sem = (pltpu.CORE_PARALLEL, pltpu.ARBITRARY)
    else:
        dim_sem = ("parallel", "arbitrary")

    outs = pl.pallas_call(
        kernel,
        out_shape=tuple(out_shape),
        grid_spec=pltpu.PrefetchScalarGridSpec(
            num_scalar_prefetch=0,
            grid=(num_splits, steps),
            in_specs=in_specs,
            out_specs=out_specs,
        ),
        compiler_params=pltpu.CompilerParams(dimension_semantics=dim_sem),
    )(fold, expand, *dense_inputs)

    if use_var:
        msum, rgbsum, regsum, varsum = outs
    else:
        msum, rgbsum, regsum = outs

    # ---- finalize (tiny reductions + scalar math: plain XLA) ----
    mask_sum = jnp.maximum(jnp.sum(msum), 1e-7)          # .clamp(min=1e-07)
    rgb_loss = jnp.sum(rgbsum) / mask_sum / 3.0
    reg_loss = jnp.sum(regsum) / mask_sum
    var_loss = jnp.sum(varsum) / mask_sum if use_var else jnp.float32(0.0)

    # ---- trace consistency loss: small elementwise abs + mean -> plain jnp ----
    trace_nn = model_outputs['trace_nn_rgb'].reshape(-1, 3).astype(jnp.float32)
    trace_render = model_outputs['trace_render_rgb'].reshape(-1, 3).astype(jnp.float32)
    # TODO(synk): general.scale_grad only rescales gradients; identity in forward.
    if mono_neilf:
        gray = jnp.array([[0.2989, 0.587, 0.114]], dtype=jnp.float32)
        trace_render = jnp.sum(trace_render * gray, axis=-1, keepdims=True)
        trace_nn = trace_nn[:, :1]
    trace_loss = jnp.sum(jnp.abs(trace_nn - trace_render)) / (trace_nn.size + 1e-9)

    smooth_loss = jnp.float32(0.0)
    mat_loss = (rgb_loss
                + smoothness_weighting * smooth_loss
                + lambertian_weighting * reg_loss
                + trace_weighting * trace_loss
                + var_weighting * var_loss)

    loss_dict = {'loss_rgb': rgb_loss,
                 'loss_reg': reg_loss,
                 'loss_trace': trace_loss}
    if use_var:
        loss_dict['loss_var'] = var_loss
    # TODO(synk): phase in {'geo','joint'} calls an external self.geo_loss module
    # (arbitrary nn.Module) which has no self-contained Pallas equivalent.
    return loss_dict, mat_loss


# ----------------------------------------------------------------------------
# Pure-JAX reference (for validation).
# ----------------------------------------------------------------------------
def _reference(model_outputs, ground_truth, progress_iter, *,
               lambertian_weighting, smoothness_weighting, trace_weighting,
               var_weighting, mono_neilf=False, remove_black=False, **_unused):
    rgb_gt = ground_truth['rgb'].reshape(-1, 3).astype(jnp.float32)
    masks = model_outputs['render_masks'].reshape(-1).astype(jnp.float32)
    if remove_black:
        valid = jnp.sum((rgb_gt > 0).astype(jnp.int32), axis=-1) > 0
        masks = masks * valid.astype(jnp.float32)
    mask_sum = jnp.maximum(masks.sum(), 1e-7)
    rgb = model_outputs['ray_rgb'].reshape(-1, 3).astype(jnp.float32)
    rgb_loss = (jnp.abs(rgb - rgb_gt) * masks[:, None]).sum() / mask_sum / 3.0
    metallic = model_outputs['metallic'].reshape(-1, 1).astype(jnp.float32)
    reg_loss = (jnp.abs(metallic) * masks[:, None]).sum() / mask_sum
    nn = model_outputs['trace_nn_rgb'].reshape(-1, 3).astype(jnp.float32)
    rr = model_outputs['trace_render_rgb'].reshape(-1, 3).astype(jnp.float32)
    if mono_neilf:
        gray = jnp.array([[0.2989, 0.587, 0.114]], dtype=jnp.float32)
        rr = jnp.sum(rr * gray, axis=-1, keepdims=True)
        nn = nn[:, :1]
    trace_loss = jnp.abs(nn - rr).sum() / (nn.size + 1e-9)
    loss_dict = dict(loss_rgb=rgb_loss, loss_reg=reg_loss, loss_trace=trace_loss)
    var_loss = jnp.float32(0.0)
    if 'rgb_var' in model_outputs and progress_iter <= 1000:
        rv = model_outputs['rgb_var'].reshape(-1, 1).astype(jnp.float32)
        rough = model_outputs['roughness'].reshape(-1, 1).astype(jnp.float32)
        tgt = (rv - 0.01) / (0.15 - 0.01)
        tgt = (1.0 - jnp.clip(tgt, 0.0, 1.0)) * (0.75 - 0.25) + 0.25
        var_loss = (jnp.abs(rough - tgt) * masks[:, None]).sum() / mask_sum
        loss_dict['loss_var'] = var_loss
    mat = (rgb_loss + smoothness_weighting * 0.0
           + lambertian_weighting * reg_loss
           + trace_weighting * trace_loss + var_weighting * var_loss)
    return loss_dict, mat


if __name__ == "__main__":
    def make_inputs(seed, n_rays, m_trace):
        ks = jax.random.split(jax.random.PRNGKey(seed), 9)
        rgb_gt = jax.random.uniform(ks[0], (n_rays, 3), jnp.float32)
        black = jax.random.uniform(ks[8], (n_rays, 1)) < 0.3   # some all-black gt rows
        rgb_gt = jnp.where(black, 0.0, rgb_gt)
        model_outputs = dict(
            render_masks=jax.random.uniform(ks[2], (n_rays,)) > 0.3,   # bool mask
            ray_rgb=jax.random.uniform(ks[1], (n_rays, 3), jnp.float32),
            metallic=jax.random.uniform(ks[3], (n_rays, 1), jnp.float32),
            roughness=jax.random.uniform(ks[4], (n_rays, 1), jnp.float32),
            rgb_var=jax.random.uniform(ks[5], (n_rays, 1), jnp.float32) * 0.2,
            trace_nn_rgb=jax.random.uniform(ks[6], (m_trace, 3), jnp.float32),
            trace_render_rgb=jax.random.uniform(ks[7], (m_trace, 3), jnp.float32),
        )
        return model_outputs, dict(rgb=rgb_gt)

    weights = dict(lambertian_weighting=0.001, smoothness_weighting=0.0005,
                   trace_weighting=0.1, var_weighting=1.0)

    cases = [
        # ragged ray count (padded to 1024), single block, var on
        (1000,  dict(progress_iter=500, remove_black=False, mono_neilf=False)),
        # evenly dividing multi-block grid + 2-way split + remove_black
        (16384, dict(progress_iter=500, remove_black=True, mono_neilf=False,
                     tile_rows=32, num_splits=2)),
        # ragged tail block + var branch disabled (conditional inputs) + mono trace
        (13000, dict(progress_iter=2000, remove_black=True, mono_neilf=True,
                     tile_rows=32, num_splits=2)),
        # duplicated (clamped) block from uneven split -> fully masked in-kernel
        (12288, dict(progress_iter=500, remove_black=False, mono_neilf=False,
                     tile_rows=32, num_splits=2)),
    ]

    for seed, (n_rays, case) in enumerate(cases):
        model_outputs, ground_truth = make_inputs(seed, n_rays, 96)
        loss_dict, mat_loss = neilf_loss(model_outputs, ground_truth,
                                         **case, **weights)
        jax.block_until_ready(mat_loss)
        ref_dict, ref_mat = _reference(model_outputs, ground_truth,
                                       **case, **weights)
        assert set(loss_dict.keys()) == set(ref_dict.keys()), (
            f"key mismatch: {loss_dict.keys()} vs {ref_dict.keys()}")
        for k in ref_dict:
            np.testing.assert_allclose(np.asarray(loss_dict[k]),
                                       np.asarray(ref_dict[k]),
                                       rtol=1e-4, atol=1e-5)
        np.testing.assert_allclose(np.asarray(mat_loss), np.asarray(ref_mat),
                                   rtol=1e-4, atol=1e-5)
    print("KERNEL_OK")
</pallas_src>

<mosaic_0001>
module attributes {stable_mosaic.version = 11 : i64} {
  func.func @_neilf_losses_kernel(%arg0: i32, %arg1: i32, %arg2: memref<384x128xf32, #tpu.memory_space<vmem>>, %arg3: memref<128x384xf32, #tpu.memory_space<vmem>>, %arg4: memref<8x384xf32, #tpu.memory_space<vmem>>, %arg5: memref<8x384xf32, #tpu.memory_space<vmem>>, %arg6: memref<8x128xi8, #tpu.memory_space<vmem>>, %arg7: memref<8x128xf32, #tpu.memory_space<vmem>>, %arg8: memref<8x128xf32, #tpu.memory_space<vmem>>, %arg9: memref<8x128xf32, #tpu.memory_space<vmem>>, %arg10: memref<1x8x128xf32, #tpu.memory_space<vmem>>, %arg11: memref<1x8x384xf32, #tpu.memory_space<vmem>>, %arg12: memref<1x8x128xf32, #tpu.memory_space<vmem>>, %arg13: memref<1x8x128xf32, #tpu.memory_space<vmem>>) attributes {dimension_semantics = [#tpu.dimension_semantics<parallel>, #tpu.dimension_semantics<arbitrary>], iteration_bounds = array<i64: 1, 1>, scalar_prefetch = 0 : i64, scratch_operands = 0 : i64, tpu.core_type = #tpu.core_type<tc>, window_params = [{pipeline_mode = #tpu.pipeline_mode<synchronous>, transform_indices = @transform_0, window_bounds = array<i64: 384, 128>}, {pipeline_mode = #tpu.pipeline_mode<synchronous>, transform_indices = @transform_1, window_bounds = array<i64: 128, 384>}, {transform_indices = @transform_2, window_bounds = array<i64: 8, 384>}, {transform_indices = @transform_3, window_bounds = array<i64: 8, 384>}, {transform_indices = @transform_4, window_bounds = array<i64: 8, 128>}, {transform_indices = @transform_5, window_bounds = array<i64: 8, 128>}, {transform_indices = @transform_6, window_bounds = array<i64: 8, 128>}, {transform_indices = @transform_7, window_bounds = array<i64: 8, 128>}, {transform_indices = @transform_8, window_bounds = array<i64: 1, 8, 128>}, {transform_indices = @transform_9, window_bounds = array<i64: 1, 8, 384>}, {transform_indices = @transform_10, window_bounds = array<i64: 1, 8, 128>}, {transform_indices = @transform_11, window_bounds = array<i64: 1, 8, 128>}]} {
    %c0_i32 = arith.constant 0 : i32
    %0 = arith.cmpi eq, %arg1, %c0_i32 : i32
    %1 = arith.extui %0 : i1 to i32
    %c0_i32_0 = arith.constant 0 : i32
    %2 = arith.cmpi ne, %1, %c0_i32_0 : i32
    scf.if %2 {
      %cst_49 = arith.constant 0.000000e+00 : f32
      %66 = vector.broadcast %cst_49 : f32 to vector<8x128xf32>
      %c0_50 = arith.constant 0 : index
      %c0_51 = arith.constant 0 : index
      %c0_52 = arith.constant 0 : index
      %67 = vector.load %arg10[%c0_50, %c0_51, %c0_52] : memref<1x8x128xf32, #tpu.memory_space<vmem>>, vector<1x8x128xf32>
      %68 = vector.shape_cast %67 : vector<1x8x128xf32> to vector<8x128xf32>
      %69 = vector.shape_cast %66 : vector<8x128xf32> to vector<1x8x128xf32>
      tpu.vector_store %arg10[%c0_50, %c0_51, %c0_52], %69 {strides = array<i32>} : memref<1x8x128xf32, #tpu.memory_space<vmem>>, vector<1x8x128xf32>,
      %cst_53 = arith.constant 0.000000e+00 : f32
      %70 = vector.broadcast %cst_53 : f32 to vector<8x384xf32>
      %c0_54 = arith.constant 0 : index
      %c0_55 = arith.constant 0 : index
      %c0_56 = arith.constant 0 : index
      %71 = vector.load %arg11[%c0_54, %c0_55, %c0_56] : memref<1x8x384xf32, #tpu.memory_space<vmem>>, vector<1x8x384xf32>
      %72 = vector.shape_cast %71 : vector<1x8x384xf32> to vector<8x384xf32>
      %73 = vector.shape_cast %70 : vector<8x384xf32> to vector<1x8x384xf32>
      tpu.vector_store %arg11[%c0_54, %c0_55, %c0_56], %73 {strides = array<i32>} : memref<1x8x384xf32, #tpu.memory_space<vmem>>, vector<1x8x384xf32>,
      %cst_57 = arith.constant 0.000000e+00 : f32
      %74 = vector.broadcast %cst_57 : f32 to vector<8x128xf32>
      %c0_58 = arith.constant 0 : index
      %c0_59 = arith.constant 0 : index
      %c0_60 = arith.constant 0 : index
      %75 = vector.load %arg12[%c0_58, %c0_59, %c0_60] : memref<1x8x128xf32, #tpu.memory_space<vmem>>, vector<1x8x128xf32>
      %76 = vector.shape_cast %75 : vector<1x8x128xf32> to vector<8x128xf32>
      %77 = vector.shape_cast %74 : vector<8x128xf32> to vector<1x8x128xf32>
      tpu.vector_store %arg12[%c0_58, %c0_59, %c0_60], %77 {strides = array<i32>} : memref<1x8x128xf32, #tpu.memory_space<vmem>>, vector<1x8x128xf32>,
      %cst_61 = arith.constant 0.000000e+00 : f32
      %78 = vector.broadcast %cst_61 : f32 to vector<8x128xf32>
      %c0_62 = arith.constant 0 : index
      %c0_63 = arith.constant 0 : index
      %c0_64 = arith.constant 0 : index
      %79 = vector.load %arg13[%c0_62, %c0_63, %c0_64] : memref<1x8x128xf32, #tpu.memory_space<vmem>>, vector<1x8x128xf32>
      %80 = vector.shape_cast %79 : vector<1x8x128xf32> to vector<8x128xf32>
      %81 = vector.shape_cast %78 : vector<8x128xf32> to vector<1x8x128xf32>
      tpu.vector_store %arg13[%c0_62, %c0_63, %c0_64], %81 {strides = array<i32>} : memref<1x8x128xf32, #tpu.memory_space<vmem>>, vector<1x8x128xf32>,
    } else {
    }
    %c0 = arith.constant 0 : index
    %c0_1 = arith.constant 0 : index
    %3 = vector.load %arg4[%c0, %c0_1] : memref<8x384xf32, #tpu.memory_space<vmem>>, vector<8x384xf32>
    %c0_2 = arith.constant 0 : index
    %c0_3 = arith.constant 0 : index
    %4 = vector.load %arg5[%c0_2, %c0_3] : memref<8x384xf32, #tpu.memory_space<vmem>>, vector<8x384xf32>
    %c0_4 = arith.constant 0 : index
    %c0_5 = arith.constant 0 : index
    %5 = vector.load %arg6[%c0_4, %c0_5] : memref<8x128xi8, #tpu.memory_space<vmem>>, vector<8x128xi8>
    %6 = arith.sitofp %5 : vector<8x128xi8> to vector<8x128xf32>
    %c0_6 = arith.constant 0 : index
    %c0_7 = arith.constant 0 : index
    %7 = vector.load %arg3[%c0_6, %c0_7] : memref<128x384xf32, #tpu.memory_space<vmem>>, vector<128x384xf32>
    %cst = arith.constant dense<0.000000e+00> : vector<8x384xf32>
    %8 = tpu.matmul %6, %7, %cst {dimension_numbers = #tpu.dot_dimension_numbers<[1], [0], [0], [1], [0, 0, 1, 1], [], []>} : vector<8x128xf32>, vector<128x384xf32>, vector<8x384xf32> -> vector<8x384xf32>
    %9 = arith.subf %4, %3 : vector<8x384xf32>
    %10 = math.absf %9 : vector<8x384xf32>
    %11 = arith.mulf %10, %8 : vector<8x384xf32>
    %c0_8 = arith.constant 0 : index
    %c0_9 = arith.constant 0 : index
    %12 = vector.load %arg7[%c0_8, %c0_9] : memref<8x128xf32, #tpu.memory_space<vmem>>, vector<8x128xf32>
    %13 = math.absf %12 : vector<8x128xf32>
    %14 = arith.mulf %13, %6 : vector<8x128xf32>
    %c0_10 = arith.constant 0 : index
    %c0_11 = arith.constant 0 : index
    %15 = vector.load %arg9[%c0_10, %c0_11] : memref<8x128xf32, #tpu.memory_space<vmem>>, vector<8x128xf32>
    %cst_12 = arith.constant 0.00999999977 : f32
    %16 = vector.broadcast %cst_12 : f32 to vector<8x128xf32>
    %17 = arith.subf %15, %16 : vector<8x128xf32>
    %cst_13 = arith.constant 7.14285707 : f32
    %18 = vector.broadcast %cst_13 : f32 to vector<8x128xf32>
    %19 = arith.mulf %17, %18 : vector<8x128xf32>
    %cst_14 = arith.constant 0.000000e+00 : f32
    %cst_15 = arith.constant 1.000000e+00 : f32
    %20 = vector.broadcast %cst_14 : f32 to vector<8x128xf32>
    %21 = arith.maximumf %20, %19 : vector<8x128xf32>
    %22 = vector.broadcast %cst_15 : f32 to vector<8x128xf32>
    %23 = arith.minimumf %22, %21 : vector<8x128xf32>
    %cst_16 = arith.constant 1.000000e+00 : f32
    %24 = vector.broadcast %cst_16 : f32 to vector<8x128xf32>
    %25 = arith.subf %24, %23 : vector<8x128xf32>
    %cst_17 = arith.constant 5.000000e-01 : f32
    %26 = vector.broadcast %cst_17 : f32 to vector<8x128xf32>
    %27 = arith.mulf %25, %26 : vector<8x128xf32>
    %cst_18 = arith.constant 2.500000e-01 : f32
    %28 = vector.broadcast %cst_18 : f32 to vector<8x128xf32>
    %29 = arith.addf %27, %28 : vector<8x128xf32>
    %c0_19 = arith.constant 0 : index
    %c0_20 = arith.constant 0 : index
    %30 = vector.load %arg8[%c0_19, %c0_20] : memref<8x128xf32, #tpu.memory_space<vmem>>, vector<8x128xf32>
    %31 = arith.subf %30, %29 : vector<8x128xf32>
    %32 = math.absf %31 : vector<8x128xf32>
    %33 = arith.mulf %32, %6 : vector<8x128xf32>
    %c0_21 = arith.constant 0 : index
    %c0_22 = arith.constant 0 : index
    %c0_23 = arith.constant 0 : index
    %34 = vector.load %arg10[%c0_21, %c0_22, %c0_23] : memref<1x8x128xf32, #tpu.memory_space<vmem>>, vector<1x8x128xf32>
    %35 = vector.shape_cast %34 : vector<1x8x128xf32> to vector<8x128xf32>
    %36 = vector.shape_cast %6 : vector<8x128xf32> to vector<1x8x128xf32>
    %cst_24 = arith.constant dense<0.000000e+00> : vector<8x128xf32>
    %37 = vector.multi_reduction <add>, %36, %cst_24 [0] : vector<1x8x128xf32> to vector<8x128xf32>
    %38 = arith.addf %35, %37 : vector<8x128xf32>
    %c0_25 = arith.constant 0 : index
    %c0_26 = arith.constant 0 : index
    %c0_27 = arith.constant 0 : index
    %39 = vector.load %arg10[%c0_25, %c0_26, %c0_27] : memref<1x8x128xf32, #tpu.memory_space<vmem>>, vector<1x8x128xf32>
    %40 = vector.shape_cast %39 : vector<1x8x128xf32> to vector<8x128xf32>
    %41 = vector.shape_cast %38 : vector<8x128xf32> to vector<1x8x128xf32>
    tpu.vector_store %arg10[%c0_25, %c0_26, %c0_27], %41 {strides = array<i32>} : memref<1x8x128xf32, #tpu.memory_space<vmem>>, vector<1x8x128xf32>,
    %c0_28 = arith.constant 0 : index
    %c0_29 = arith.constant 0 : index
    %c0_30 = arith.constant 0 : index
    %42 = vector.load %arg11[%c0_28, %c0_29, %c0_30] : memref<1x8x384xf32, #tpu.memory_space<vmem>>, vector<1x8x384xf32>
    %43 = vector.shape_cast %42 : vector<1x8x384xf32> to vector<8x384xf32>
    %44 = vector.shape_cast %11 : vector<8x384xf32> to vector<1x8x384xf32>
    %cst_31 = arith.constant dense<0.000000e+00> : vector<8x384xf32>
    %45 = vector.multi_reduction <add>, %44, %cst_31 [0] : vector<1x8x384xf32> to vector<8x384xf32>
    %46 = arith.addf %43, %45 : vector<8x384xf32>
    %c0_32 = arith.constant 0 : index
    %c0_33 = arith.constant 0 : index
    %c0_34 = arith.constant 0 : index
    %47 = vector.load %arg11[%c0_32, %c0_33, %c0_34] : memref<1x8x384xf32, #tpu.memory_space<vmem>>, vector<1x8x384xf32>
    %48 = vector.shape_cast %47 : vector<1x8x384xf32> to vector<8x384xf32>
    %49 = vector.shape_cast %46 : vector<8x384xf32> to vector<1x8x384xf32>
    tpu.vector_store %arg11[%c0_32, %c0_33, %c0_34], %49 {strides = array<i32>} : memref<1x8x384xf32, #tpu.memory_space<vmem>>, vector<1x8x384xf32>,
    %c0_35 = arith.constant 0 : index
    %c0_36 = arith.constant 0 : index
    %c0_37 = arith.constant 0 : index
    %50 = vector.load %arg12[%c0_35, %c0_36, %c0_37] : memref<1x8x128xf32, #tpu.memory_space<vmem>>, vector<1x8x128xf32>
    %51 = vector.shape_cast %50 : vector<1x8x128xf32> to vector<8x128xf32>
    %52 = vector.shape_cast %14 : vector<8x128xf32> to vector<1x8x128xf32>
    %cst_38 = arith.constant dense<0.000000e+00> : vector<8x128xf32>
    %53 = vector.multi_reduction <add>, %52, %cst_38 [0] : vector<1x8x128xf32> to vector<8x128xf32>
    %54 = arith.addf %51, %53 : vector<8x128xf32>
    %c0_39 = arith.constant 0 : index
    %c0_40 = arith.constant 0 : index
    %c0_41 = arith.constant 0 : index
    %55 = vector.load %arg12[%c0_39, %c0_40, %c0_41] : memref<1x8x128xf32, #tpu.memory_space<vmem>>, vector<1x8x128xf32>
    %56 = vector.shape_cast %55 : vector<1x8x128xf32> to vector<8x128xf32>
    %57 = vector.shape_cast %54 : vector<8x128xf32> to vector<1x8x128xf32>
    tpu.vector_store %arg12[%c0_39, %c0_40, %c0_41], %57 {strides = array<i32>} : memref<1x8x128xf32, #tpu.memory_space<vmem>>, vector<1x8x128xf32>,
    %c0_42 = arith.constant 0 : index
    %c0_43 = arith.constant 0 : index
    %c0_44 = arith.constant 0 : index
    %58 = vector.load %arg13[%c0_42, %c0_43, %c0_44] : memref<1x8x128xf32, #tpu.memory_space<vmem>>, vector<1x8x128xf32>
    %59 = vector.shape_cast %58 : vector<1x8x128xf32> to vector<8x128xf32>
    %60 = vector.shape_cast %33 : vector<8x128xf32> to vector<1x8x128xf32>
    %cst_45 = arith.constant dense<0.000000e+00> : vector<8x128xf32>
    %61 = vector.multi_reduction <add>, %60, %cst_45 [0] : vector<1x8x128xf32> to vector<8x128xf32>
    %62 = arith.addf %59, %61 : vector<8x128xf32>
    %c0_46 = arith.constant 0 : index
    %c0_47 = arith.constant 0 : index
    %c0_48 = arith.constant 0 : index
    %63 = vector.load %arg13[%c0_46, %c0_47, %c0_48] : memref<1x8x128xf32, #tpu.memory_space<vmem>>, vector<1x8x128xf32>
    %64 = vector.shape_cast %63 : vector<1x8x128xf32> to vector<8x128xf32>
    %65 = vector.shape_cast %62 : vector<8x128xf32> to vector<1x8x128xf32>
    tpu.vector_store %arg13[%c0_46, %c0_47, %c0_48], %65 {strides = array<i32>} : memref<1x8x128xf32, #tpu.memory_space<vmem>>, vector<1x8x128xf32>,
    return
  }
  func.func @transform_0(%arg0: i32, %arg1: i32) -> (i32, i32) {
    %c0_i32 = arith.constant 0 : i32
    %c0_i32_0 = arith.constant 0 : i32
    %c0_i32_1 = arith.constant 0 : i32
    return %c0_i32, %c0_i32_0 : i32, i32
  }
  func.func @transform_1(%arg0: i32, %arg1: i32) -> (i32, i32) {
    %c0_i32 = arith.constant 0 : i32
    %c0_i32_0 = arith.constant 0 : i32
    %c0_i32_1 = arith.constant 0 : i32
    return %c0_i32, %c0_i32_0 : i32, i32
  }
  func.func @transform_2(%arg0: i32, %arg1: i32) -> (i32, i32) {
    %c1_i32 = arith.constant 1 : i32
    %0 = arith.muli %arg0, %c1_i32 : i32
    %1 = arith.addi %0, %arg1 : i32
    %c0_i32 = arith.constant 0 : i32
    %2 = arith.minsi %1, %c0_i32 : i32
    %c0_i32_0 = arith.constant 0 : i32
    %c0_i32_1 = arith.constant 0 : i32
    return %2, %c0_i32_0 : i32, i32
  }
  func.func @transform_3(%arg0: i32, %arg1: i32) -> (i32, i32) {
    %c1_i32 = arith.constant 1 : i32
    %0 = arith.muli %arg0, %c1_i32 : i32
    %1 = arith.addi %0, %arg1 : i32
    %c0_i32 = arith.constant 0 : i32
    %2 = arith.minsi %1, %c0_i32 : i32
    %c0_i32_0 = arith.constant 0 : i32
    %c0_i32_1 = arith.constant 0 : i32
    return %2, %c0_i32_0 : i32, i32
  }
  func.func @transform_4(%arg0: i32, %arg1: i32) -> (i32, i32) {
    %c1_i32 = arith.constant 1 : i32
    %0 = arith.muli %arg0, %c1_i32 : i32
    %1 = arith.addi %0, %arg1 : i32
    %c0_i32 = arith.constant 0 : i32
    %2 = arith.minsi %1, %c0_i32 : i32
    %c0_i32_0 = arith.constant 0 : i32
    %c0_i32_1 = arith.constant 0 : i32
    return %2, %c0_i32_0 : i32, i32
  }
  func.func @transform_5(%arg0: i32, %arg1: i32) -> (i32, i32) {
    %c1_i32 = arith.constant 1 : i32
    %0 = arith.muli %arg0, %c1_i32 : i32
    %1 = arith.addi %0, %arg1 : i32
    %c0_i32 = arith.constant 0 : i32
    %2 = arith.minsi %1, %c0_i32 : i32
    %c0_i32_0 = arith.constant 0 : i32
    %c0_i32_1 = arith.constant 0 : i32
    return %2, %c0_i32_0 : i32, i32
  }
  func.func @transform_6(%arg0: i32, %arg1: i32) -> (i32, i32) {
    %c1_i32 = arith.constant 1 : i32
    %0 = arith.muli %arg0, %c1_i32 : i32
    %1 = arith.addi %0, %arg1 : i32
    %c0_i32 = arith.constant 0 : i32
    %2 = arith.minsi %1, %c0_i32 : i32
    %c0_i32_0 = arith.constant 0 : i32
    %c0_i32_1 = arith.constant 0 : i32
    return %2, %c0_i32_0 : i32, i32
  }
  func.func @transform_7(%arg0: i32, %arg1: i32) -> (i32, i32) {
    %c1_i32 = arith.constant 1 : i32
    %0 = arith.muli %arg0, %c1_i32 : i32
    %1 = arith.addi %0, %arg1 : i32
    %c0_i32 = arith.constant 0 : i32
    %2 = arith.minsi %1, %c0_i32 : i32
    %c0_i32_0 = arith.constant 0 : i32
    %c0_i32_1 = arith.constant 0 : i32
    return %2, %c0_i32_0 : i32, i32
  }
  func.func @transform_8(%arg0: i32, %arg1: i32) -> (i32, i32, i32) {
    %c0_i32 = arith.constant 0 : i32
    %c0_i32_0 = arith.constant 0 : i32
    %c0_i32_1 = arith.constant 0 : i32
    return %arg0, %c0_i32, %c0_i32_0 : i32, i32, i32
  }
  func.func @transform_9(%arg0: i32, %arg1: i32) -> (i32, i32, i32) {
    %c0_i32 = arith.constant 0 : i32
    %c0_i32_0 = arith.constant 0 : i32
    %c0_i32_1 = arith.constant 0 : i32
    return %arg0, %c0_i32, %c0_i32_0 : i32, i32, i32
  }
  func.func @transform_10(%arg0: i32, %arg1: i32) -> (i32, i32, i32) {
    %c0_i32 = arith.constant 0 : i32
    %c0_i32_0 = arith.constant 0 : i32
    %c0_i32_1 = arith.constant 0 : i32
    return %arg0, %c0_i32, %c0_i32_0 : i32, i32, i32
  }
  func.func @transform_11(%arg0: i32, %arg1: i32) -> (i32, i32, i32) {
    %c0_i32 = arith.constant 0 : i32
    %c0_i32_0 = arith.constant 0 : i32
    %c0_i32_1 = arith.constant 0 : i32
    return %arg0, %c0_i32, %c0_i32_0 : i32, i32, i32
  }
}

</mosaic_0001>

<bundles_post_ra>
// kernel: tpu_custom_call.1
= control target key start
LH: loop header
LB: loop body
LE: loop exit
PB: predicated region body
PF: predicated region fallthrough
CT: control target
= control target key end

     0   :  { %17 = vsyncpa [#allocation3], 0  ;;  %s868_s0 = inlined_call_operand.hbm [shape: f32[384,128], index: 0, kind: input, shape index: {}]   ;;  %s869_s1 = inlined_call_operand.hbm [shape: f32[128,384], index: 1, kind: input, shape index: {}]   ;;  %s870_s2 = inlined_call_operand.hbm [shape: f32[8,384], index: 2, kind: input, shape index: {}]   ;;  %s871_s3 = inlined_call_operand.hbm [shape: f32[8,384], index: 3, kind: input, shape index: {}]   ;;  %s872_s4 = inlined_call_operand.vmem [shape: s8[8,128], index: 4, kind: input, shape index: {}]   ;;  %s873_s5 = inlined_call_operand.hbm [shape: f32[8,128], index: 5, kind: input, shape index: {}]   ;;  %s874_s6 = inlined_call_operand.hbm [shape: f32[8,128], index: 6, kind: input, shape index: {}]   ;;  %s875_s7 = inlined_call_operand.hbm [shape: f32[8,128], index: 7, kind: input, shape index: {}]   ;;  %s876_s8 = inlined_call_operand.hbm [shape: f32[1,8,128], index: 8, kind: output, shape index: {0}]   ;;  %s877_s9 = inlined_call_operand.hbm [shape: f32[1,8,384], index: 9, kind: output, shape index: {1}]   ;;  %s878_s10 = inlined_call_operand.hbm [shape: f32[1,8,128], index: 10, kind: output, shape index: {2}]   ;;  %s879_s11 = inlined_call_operand.hbm [shape: f32[1,8,128], index: 11, kind: output, shape index: {3}]  }
   0x1   :  { %18 = vsyncpa [#allocation6], 0 }
   0x2   :  { %19 = vsyncpa [#allocation9], 0 }
   0x3   :  { %20 = vsyncpa [#allocation12], 0 }
   0x4   :  { %21 = vsyncpa [#allocation4], 0 }
   0x5   :  { %22 = vsyncpa [#allocation16], 0  ;;  %s41_s19 = sshll.u32 %s869_s1, 4  ;;  %s42_s19 = int_to_ptr.hbm [resolvable:$true] %s41_s19 }
   0x6   :  { %23 = vsyncpa [#allocation19], 0  ;;  %s757_s20 = smov [#allocation5]   ;;  %s78_s24 = sshll.u32 %s871_s3, 4  ;;  %s79_s24 = int_to_ptr.hbm [resolvable:$true] %s78_s24 }
   0x7   :  { %s43_s21 = sshll.u32 %s757_s20, 4  ;;  %s758_s25 = smov 384   ;;  %s44_s21 = int_to_ptr.vmem [resolvable:$true] %s43_s21 }
   0x8   :  { %s759_s26 = smov 24   ;;  %s760_s27 = smov [#allocation8]  }
   0x9   :  { %49 = dma.hbm_to_vmem [thread:$0]  %s42_s19, 6144, %s44_s21, [#allocation6], %s758_s25, %s758_s25, %s759_s26  }
   0xa   :  { %s80_s28 = sshll.u32 %s760_s27, 4  ;;  %s122_s12 = sshll.u32 %s874_s6, 4  ;;  %s81_s28 = int_to_ptr.vmem [resolvable:$true] %s80_s28  ;;  %s123_s12 = int_to_ptr.hbm [resolvable:$true] %s122_s12 }
   0xb   :  { %83 = dma.hbm_to_vmem [thread:$0]  %s79_s24, 384, %s81_s28, [#allocation9]  }
   0xc   :  { %s28_s14 = sshll.u32 %s868_s0, 4  ;;  %s761_s15 = smov [#allocation11]   ;;  %s29_s14 = int_to_ptr.hbm [resolvable:$true] %s28_s14 }
   0xd   :  { %s124_s16 = sshll.u32 %s761_s15, 4  ;;  %s762_s3 = smov [#allocation2]   ;;  %s125_s16 = int_to_ptr.vmem [resolvable:$true] %s124_s16 }
   0xe   :  { %127 = dma.hbm_to_vmem [thread:$0]  %s123_s12, 128, %s125_s16, [#allocation12]  }
   0xf   :  { %s30_s17 = sshll.u32 %s762_s3, 4  ;;  %s763_s18 = smov 128   ;;  %s31_s17 = int_to_ptr.vmem [resolvable:$true] %s30_s17 }
  0x10   :  { %s764_s19 = smov 8   ;;  %s61_s21 = sshll.u32 %s870_s2, 4  ;;  %s62_s21 = int_to_ptr.hbm [resolvable:$true] %s61_s21 }
  0x11   :  { %36 = dma.hbm_to_vmem [thread:$0]  %s29_s14, 6144, %s31_s17, [#allocation3], %s763_s18, %s763_s18, %s764_s19  }
  0x12   :  { %s765_s22 = smov [#allocation7]   ;;  %s106_s25 = sshll.u32 %s873_s5, 4  ;;  %s107_s25 = int_to_ptr.hbm [resolvable:$true] %s106_s25 }
  0x13   :  { %s63_s23 = sshll.u32 %s765_s22, 4  ;;  %s766_s26 = smov [#allocation10]   ;;  %s64_s23 = int_to_ptr.vmem [resolvable:$true] %s63_s23 }
  0x14   :  { %66 = dma.hbm_to_vmem [thread:$0]  %s62_s21, 384, %s64_s23, [#allocation6]  }
  0x15   :  { %s108_s27 = sshll.u32 %s766_s26, 4  ;;  %s138_s30 = sshll.u32 %s875_s7, 4  ;;  %s109_s27 = int_to_ptr.vmem [resolvable:$true] %s108_s27  ;;  %s139_s30 = int_to_ptr.hbm [resolvable:$true] %s138_s30 }
  0x16   :  { %111 = dma.hbm_to_vmem [thread:$0]  %s107_s25, 128, %s109_s27, [#allocation9]  }
  0x17   :  { %s767_s2 = smov [#allocation13]  }
  0x18   :  { %s140_s12 = sshll.u32 %s767_s2, 4  ;;  %s141_s12 = int_to_ptr.vmem [resolvable:$true] %s140_s12 }
  0x19   :  { %143 = dma.hbm_to_vmem [thread:$0]  %s139_s30, 128, %s141_s12, [#allocation12]  }
  0x1a   :  { %743 = dma.done.wait [#allocation3], 6144  }
  0x1b   :  { %744 = vsyncadd [#allocation3], 4294961152 }
  0x1c   :  { %745 = dma.done.wait [#allocation6], 6528  }
  0x1d   :  { %746 = vsyncadd [#allocation6], 4294960768 }
  0x1e   :  { %747 = dma.done.wait [#allocation9], 512  }
  0x1f   :  { %748 = vsyncadd [#allocation9], 4294966784 }
  0x20   :  { %749 = dma.done.wait [#allocation12], 256  }
  0x21   :  { %750 = vsyncadd [#allocation12], 4294967040  ;;  %v270_v0 = vld [vmem:[#allocation5 + $0x178] sm:$0xff]  ;;  %v267_v1 = vld [vmem:[#allocation5 + $0x160] sm:$0xff]  ;;  %s386_s15 = sshll.u32 %s876_s8, 4  ;;  %s769_s16 = smov [#allocation18]   ;;  %s387_s15 = int_to_ptr.hbm [resolvable:$true] %s386_s15 }
  0x22   :  { %311 = vmatpush.msra.mxu2 %v270_v0  ;;  %v268_v2 = vld [vmem:[#allocation5 + $0x168] sm:$0xff]  ;;  %v269_v3 = vld [vmem:[#allocation5 + $0x170] sm:$0xff]  ;;  %v266_v6 = vld [vmem:[#allocation5 + $0x158] sm:$0xff]  ;;  %s417_s3 = sshll.u32 %s769_s16, 4  ;;  %s419_s19 = sshll.u32 %s879_s11, 4  ;;  %s418_s3 = int_to_ptr.vmem [resolvable:$true] %s417_s3  ;;  %s420_s19 = int_to_ptr.hbm [resolvable:$true] %s419_s19 }
  0x23   :  { %v264_v4 = vld [vmem:[#allocation5 + $0x148] sm:$0xff]  ;;  %271 = vmatpush.msra.mxu0 %v268_v2  ;;  %291 = vmatpush.msra.mxu1 %v269_v3  ;;  %v265_v5 = vld [vmem:[#allocation5 + $0x150] sm:$0xff]  ;;  %v262_v7 = vld [vmem:[#allocation5 + $0x138] sm:$0xff]  ;;  %s770_s8 = smov [#allocation15]   ;;  %s397_s21 = sshll.u32 %s877_s9, 4  ;;  %s398_s21 = int_to_ptr.hbm [resolvable:$true] %s397_s21 }
  0x24   :  { %312 = vmatpush.msra.mxu2 %v267_v1  ;;  %v263_v8 = vld [vmem:[#allocation5 + $0x140] sm:$0xff]  ;;  %v261_v9 = vld [vmem:[#allocation5 + $0x130] sm:$0xff]  ;;  %v260_v11 = vld [vmem:[#allocation5 + $0x128] sm:$0xff]  ;;  %s395_s11 = sshll.u32 %s770_s8, 4  ;;  %s771_s22 = smov [#allocation17]   ;;  %s396_s11 = int_to_ptr.vmem [resolvable:$true] %s395_s11 }
  0x25   :  { %272 = vmatpush.msra.mxu0 %v265_v5  ;;  %292 = vmatpush.msra.mxu1 %v266_v6  ;;  %v259_v10 = vld [vmem:[#allocation5 + $0x120] sm:$0xff]  ;;  %v258_v12 = vld [vmem:[#allocation5 + $0x118] sm:$0xff]  ;;  %v256_v13 = vld [vmem:[#allocation5 + $0x108] sm:$0xff]  ;;  %s406_s23 = sshll.u32 %s771_s22, 4  ;;  %s408_s25 = sshll.u32 %s878_s10, 4  ;;  %s407_s23 = int_to_ptr.vmem [resolvable:$true] %s406_s23  ;;  %s409_s25 = int_to_ptr.hbm [resolvable:$true] %s408_s25 }
  0x26   :  { %313 = vmatpush.msra.mxu2 %v264_v4  ;;  %v257_v14 = vld [vmem:[#allocation5 + $0x110] sm:$0xff]  ;;  %v255_v15 = vld [vmem:[#allocation5 + $0x100] sm:$0xff]  ;;  %v254_v17 = vld [vmem:[#allocation5 + $0xf8] sm:$0xff] }
  0x27   :  { %273 = vmatpush.msra.mxu0 %v262_v7  ;;  %293 = vmatpush.msra.mxu1 %v263_v8  ;;  %v253_v16 = vld [vmem:[#allocation5 + $0xf0] sm:$0xff]  ;;  %v252_v18 = vld [vmem:[#allocation5 + $0xe8] sm:$0xff]  ;;  %v250_v19 = vld [vmem:[#allocation5 + $0xd8] sm:$0xff] }
  0x28   :  { %314 = vmatpush.msra.mxu2 %v261_v9  ;;  %v251_v20 = vld [vmem:[#allocation5 + $0xe0] sm:$0xff]  ;;  %v249_v21 = vld [vmem:[#allocation5 + $0xd0] sm:$0xff]  ;;  %v248_v23 = vld [vmem:[#allocation5 + $0xc8] sm:$0xff] }
  0x29   :  { %274 = vmatpush.msra.mxu0 %v259_v10  ;;  %294 = vmatpush.msra.mxu1 %v260_v11  ;;  %v247_v22 = vld [vmem:[#allocation5 + $0xc0] sm:$0xff]  ;;  %v246_v24 = vld [vmem:[#allocation5 + $0xb8] sm:$0xff]  ;;  %v244_v25 = vld [vmem:[#allocation5 + $0xa8] sm:$0xff] }
  0x2a   :  { %315 = vmatpush.msra.mxu2 %v258_v12  ;;  %v245_v26 = vld [vmem:[#allocation5 + $0xb0] sm:$0xff]  ;;  %v243_v27 = vld [vmem:[#allocation5 + $0xa0] sm:$0xff]  ;;  %v242_v29 = vld [vmem:[#allocation5 + $0x98] sm:$0xff] }
  0x2b   :  { %275 = vmatpush.msra.mxu0 %v256_v13  ;;  %295 = vmatpush.msra.mxu1 %v257_v14  ;;  %v241_v28 = vld [vmem:[#allocation5 + $0x90] sm:$0xff]  ;;  %v240_v30 = vld [vmem:[#allocation5 + $0x88] sm:$0xff]  ;;  %v238_v31 = vld [vmem:[#allocation5 + $0x78] sm:$0xff] }
  0x2c   :  { %316 = vmatpush.msra.mxu2 %v255_v15  ;;  %v239_v32 = vld [vmem:[#allocation5 + $0x80] sm:$0xff]  ;;  %v237_v33 = vld [vmem:[#allocation5 + $0x70] sm:$0xff]  ;;  %v236_v35 = vld [vmem:[#allocation5 + $0x68] sm:$0xff] }
  0x2d   :  { %276 = vmatpush.msra.mxu0 %v253_v16  ;;  %296 = vmatpush.msra.mxu1 %v254_v17  ;;  %v235_v34 = vld [vmem:[#allocation5 + $0x60] sm:$0xff]  ;;  %v234_v37 = vld [vmem:[#allocation5 + $0x58] sm:$0xff]  ;;  %v232_v38 = vld [vmem:[#allocation5 + $0x48] sm:$0xff] }
  0x2e   :  { %317 = vmatpush.msra.mxu2 %v252_v18  ;;  %v220_v36 = vld [vmem:[%s872_s4] sm:$0x3]  ;;  %v233_v39 = vld [vmem:[#allocation5 + $0x50] sm:$0xff]  ;;  %v230_v43 = vld [vmem:[#allocation5 + $0x38] sm:$0xff]  ;;  %s768_s4 = smov [#allocation14]  }
  0x2f   :  { %277 = vmatpush.msra.mxu0 %v250_v19  ;;  %297 = vmatpush.msra.mxu1 %v251_v20  ;;  %v231_v40 = vld [vmem:[#allocation5 + $0x40] sm:$0xff]  ;;  %v221_v41 = vunpack.c.0.s8 %v220_v36  ;;  %v229_v42 = vld [vmem:[#allocation5 + $0x30] sm:$0xff]  ;;  %v228_v44 = vld [vmem:[#allocation5 + $0x28] sm:$0xff]  ;;  %s384_s1 = sshll.u32 %s768_s4, 4  ;;  %s385_s1 = int_to_ptr.vmem [resolvable:$true] %s384_s1 }
  0x30   :  { %318 = vmatpush.msra.mxu2 %v249_v21  ;;  %v226_v45 = vld [vmem:[#allocation5 + $0x18] sm:$0xff]  ;;  %v227_v46 = vld [vmem:[#allocation5 + $0x20] sm:$0xff]  ;;  %v225_v47 = vld [vmem:[#allocation5 + $0x10] sm:$0xff] }
  0x31   :  { %278 = vmatpush.msra.mxu0 %v247_v22  ;;  %298 = vmatpush.msra.mxu1 %v248_v23  ;;  %v222_v48 = vcvt.s32.f32 %v221_v41  ;;  %v223_v49 = vld [vmem:[#allocation5] sm:$0xff]  ;;  %v224_v50 = vld [vmem:[#allocation5 + $0x8] sm:$0xff]  ;;  %v351_v59 = vld [vmem:[#allocation11] sm:$0xff] }
  0x32   :  { %319 = vmatpush.msra.mxu2 %v246_v24  ;;  %v343_v51 = vld [vmem:[#allocation13] sm:$0xff]  ;;  %v340_v61 = vld [vmem:[#allocation10] sm:$0xff]  ;;  %v217_v3 = vld [vmem:[#allocation8] sm:$0xff] }
  0x33   :  { %279 = vmatpush.msra.mxu0 %v244_v25  ;;  %299 = vmatpush.msra.mxu1 %v245_v26  ;;  %v462_v52 = vadd.f32 -0.01, %v343_v51  ;;  %v341_v62 = vand.u32 2147483647, %v340_v61  ;;  %358 = vst [vmem:[#allocation14] sm:$0xff] %v222_v48  ;;  %v214_v2 = vld [vmem:[#allocation7] sm:$0xff] }
  0x34   :  { %320 = vmatpush.msra.mxu2 %v243_v27  ;;  %389 = dma.vmem_to_hbm [thread:$0]  %s385_s1, 128, %s387_s15, [#allocation4]   ;;  %v215_v4 = vld [vmem:[#allocation7 + $0x8] sm:$0xff]  ;;  %v218_v5 = vld [vmem:[#allocation8 + $0x8] sm:$0xff]  ;;  %v331_v6 = vsub.f32 %v217_v3, %v214_v2  ;;  %v216_v8 = vld [vmem:[#allocation7 + $0x10] sm:$0xff] }
  0x35   :  { %280 = vmatpush.msra.mxu0 %v241_v28  ;;  %300 = vmatpush.msra.mxu1 %v242_v29  ;;  %v345_v53 = vmul.f32 7.142857, %v462_v52  ;;  %v342_v0 = vmul.f32 %v341_v62, %v222_v48  ;;  %v332_v7 = vsub.f32 %v218_v5, %v215_v4  ;;  %v219_v9 = vld [vmem:[#allocation8 + $0x10] sm:$0xff] }
  0x36   :  { %321 = vmatpush.msra.mxu2 %v240_v30  ;;  %v334_v10 = vand.u32 2147483647, %v331_v6  ;;  %v333_v12 = vsub.f32 %v219_v9, %v216_v8 }
  0x37   :  { %281 = vmatpush.msra.mxu0 %v238_v31  ;;  %301 = vmatpush.msra.mxu1 %v239_v32  ;;  %v346_v54 = vmax.f32 %v345_v53, 0.0  ;;  %374 = vst [vmem:[#allocation17] sm:$0xff] %v342_v0  ;;  %v335_v11 = vand.u32 2147483647, %v332_v7 }
  0x38   :  { %322 = vmatpush.msra.mxu2 %v237_v33  ;;  %v336_v17 = vand.u32 2147483647, %v333_v12 }
  0x39   :  { %282 = vmatpush.msra.mxu0 %v235_v34  ;;  %302 = vmatpush.msra.mxu1 %v236_v35  ;;  %v347_v55 = vmin.f32 %v346_v54, 1.0 }
  0x3a   :  { %323 = vmatpush.msra.mxu2 %v234_v37 }
  0x3b   :  { %283 = vmatpush.msra.mxu0 %v232_v38  ;;  %303 = vmatpush.msra.mxu1 %v233_v39  ;;  %v348_v56 = vsub.f32 1.0, %v347_v55 }
  0x3c   :  { %324 = vmatpush.msra.mxu2 %v231_v40 }
  0x3d   :  { %284 = vmatpush.msra.mxu0 %v229_v42  ;;  %304 = vmatpush.msra.mxu1 %v230_v43  ;;  %v349_v57 = vmul.f32 0.5, %v348_v56 }
  0x3e   :  { %325 = vmatpush.msra.mxu2 %v228_v44 }
  0x3f   :  { %285 = vmatpush.msra.mxu0 %v226_v45  ;;  %305 = vmatpush.msra.mxu1 %v227_v46  ;;  %v350_v58 = vadd.f32 0.25, %v349_v57 }
  0x40   :  { %326 = vmatpush.msra.mxu2 %v225_v47 }
  0x41   :  { %327 = vmatmul.f32.vlgmr.msra.gmra.mxu2 %v222_v48  ;;  %286 = vmatpush.msra.mxu0 %v223_v49  ;;  %v352_v60 = vsub.f32 %v351_v59, %v350_v58 }
  0x42   :  { %306 = vmatpush.msra.mxu1 %v224_v50  ;;  %287 = vmatmul.f32.vlgmr.msra.gmra.mxu0 %v222_v48 }
  0x43   :  { %307 = vmatmul.f32.vlgmr.msra.gmra.mxu1 %v222_v48  ;;  %v353_v63 = vand.u32 2147483647, %v352_v60 }
  0x45   :  { %v354_v1 = vmul.f32 %v353_v63, %v222_v48 }
  0x47   :  { %378 = vst [vmem:[#allocation18] sm:$0xff] %v354_v1 }
  0x48   :  { %422 = dma.vmem_to_hbm [thread:$0]  %s418_s3, 128, %s420_s19, [#allocation19]  }
  0xbf   :  { %v288_v13 = vpop.f32.mrf.mxu0 }
  0xc0   :  { %v337_v14 = vmul.f32 %v334_v10, %v288_v13  ;;  %v308_v15 = vpop.f32.mrf.mxu1 }
  0xc1   :  { %v338_v16 = vmul.f32 %v335_v11, %v308_v15 }
  0xc2   :  { %368 = vst [vmem:[#allocation15] sm:$0xff] %v337_v14 }
  0xc3   :  { %369 = vst [vmem:[#allocation15 + $0x8] sm:$0xff] %v338_v16 }
  0xc4   :  { %v328_v18 = vpop.f32.mrf.mxu2 }
  0xc5   :  { %v339_v19 = vmul.f32 %v336_v17, %v328_v18 }
  0xc7   :  { %370 = vst [vmem:[#allocation15 + $0x10] sm:$0xff] %v339_v19 }
  0xc8   :  { %400 = dma.vmem_to_hbm [thread:$0]  %s396_s11, 384, %s398_s21, [#allocation16]  }
  0xc9   :  { %411 = dma.vmem_to_hbm [thread:$0]  %s407_s23, 128, %s409_s25, [#allocation16]  }
  0xca   :  { %751 = dma.done.wait [#allocation4], 128  }
  0xcb   :  { %752 = vsyncadd [#allocation4], 4294967168 }
  0xcc   :  { %753 = dma.done.wait [#allocation16], 512  }
  0xcd   :  { %754 = vsyncadd [#allocation16], 4294966784 }
  0xce   :  { %755 = dma.done.wait [#allocation19], 128  }
  0xcf   :  { %756 = vsyncadd [#allocation19], 4294967168 }
  0xd0   :  { %439 = vsyncpa [#allocation3], 1 }
  0xd1   :  { %440 = vsyncpa [#allocation6], 1 }
  0xd2   :  { %441 = vsyncpa [#allocation9], 1 }
  0xd3   :  { %442 = vsyncpa [#allocation12], 1 }
  0xd4   :  { %443 = vsyncpa [#allocation4], 1 }
  0xd5   :  { %444 = vsyncpa [#allocation16], 1 }
  0xd6   :  { %445 = vsyncpa [#allocation19], 1 }

</bundles_post_ra>
